<compile_context>
chip_gen: v7x
topology: tpu7x:2x2x1
jax: 0.10.0
libtpu: 0.0.40
codegen_flags: <defaults>
</compile_context>

<pallas_src>
import functools
from typing import NamedTuple

import jax
import jax.numpy as jnp
from jax.experimental import pallas as pl
from jax.experimental.pallas import tpu as pltpu


def relation_net_kernel(x_ref, w1_ref, b1_ref, w2_ref, b2_ref, out_ref):
    # x arrives in its original f32 layout; cast to bf16 in-kernel (cheap VPU pack,
    # hidden under the MXU/DMA pipeline) instead of materializing a bf16 copy in HBM.
    x = x_ref[...].astype(jnp.bfloat16)
    # fc1: (TM, D_in)[bf16] @ (D_in, Hp)[bf16] -> f32 accumulate, bias + ReLU in f32.
    h = jnp.dot(x, w1_ref[...], preferred_element_type=jnp.float32)
    h = jnp.maximum(h + b1_ref[...], 0.0)
    # fc2: activations back to bf16 for the MXU, accumulate in f32.
    logits = jnp.dot(h.astype(w2_ref.dtype), w2_ref[...],
                     preferred_element_type=jnp.float32)
    logits = logits + b2_ref[...]
    # Numerically stable softmax over the lane-dense (128-padded) class axis.
    # Padded classes carry a -1e30 bias -> exp underflows to exactly 0, so the
    # normalization over the real classes is unchanged.
    m = jnp.max(logits, axis=-1, keepdims=True)
    e = jnp.exp(logits - m)
    denom = jnp.sum(e, axis=-1, keepdims=True)
    out_ref[...] = (e * pl.reciprocal(denom, approx=True)).astype(out_ref.dtype)


def _round_up(n, m):
    return ((n + m - 1) // m) * m


def _choose_grid(batch, target_tile=1024):
    """Pick (block_m, padded_batch).

    Large tiles amortize per-grid-step overhead (sweep-informed target ~1024 rows;
    VMEM per step is only ~block_m * ~1.2 KB double-buffered). The tile count is kept
    even and >= 2 so v7x's two TensorCores both get work; block_m stays a multiple of
    the 8-row sublane granularity so tiny batches are barely padded.
    """
    num_tiles = max(2, pl.cdiv(batch, target_tile))
    if num_tiles % 2:
        num_tiles += 1
    block_m = _round_up(pl.cdiv(batch, num_tiles), 8)
    return block_m, num_tiles * block_m


class PreparedParams(NamedTuple):
    w1p: jax.Array     # (D_in, Hp) bf16, zero-padded hidden columns
    b1p: jax.Array     # (1, Hp)   f32,  zero-padded
    w2p: jax.Array     # (Hp, Cp)  bf16, zero-padded
    b2p: jax.Array     # (1, Cp)   f32,  -1e30 on padded classes (softmax-neutral)
    num_classes: int


def prepare_params(w1, b1, w2, b2):
    """Pad/cast the weights ONCE (hoisted out of the per-call forward path).

    Zero hidden-padding contributes nothing through fc2 and the -1e30 class-bias
    padding vanishes under softmax, so the padding is exact.
    """
    input_dim, hidden_dim = w1.shape
    num_classes = w2.shape[1]
    hp = _round_up(max(hidden_dim, 128), 128)   # lane-dense minimum; do NOT widen to 256
    cp = _round_up(max(num_classes, 128), 128)

    w1p = jnp.zeros((input_dim, hp), jnp.bfloat16).at[:, :hidden_dim].set(
        w1.astype(jnp.bfloat16))
    b1p = jnp.zeros((1, hp), jnp.float32).at[:, :hidden_dim].set(
        jnp.reshape(b1, (1, hidden_dim)).astype(jnp.float32))
    w2p = jnp.zeros((hp, cp), jnp.bfloat16).at[:hidden_dim, :num_classes].set(
        w2.astype(jnp.bfloat16))
    b2p = jnp.full((1, cp), -1e30, jnp.float32).at[:, :num_classes].set(
        jnp.reshape(b2, (1, num_classes)).astype(jnp.float32))
    return PreparedParams(w1p, b1p, w2p, b2p, num_classes)


def relation_net_forward(x, params: PreparedParams, *, block_m=None,
                         target_tile=1024, out_dtype=jnp.bfloat16):
    """x: (B, D_in) -> (B, num_classes) softmax probabilities.

    out_dtype defaults to bf16 (halves the kernel's HBM writeback and the slice cost);
    pass jnp.float32 for exact f32 output parity with the PyTorch module.
    """
    batch, input_dim = x.shape
    hp = params.w1p.shape[1]
    cp = params.w2p.shape[1]
    num_classes = params.num_classes

    if block_m is None:
        block_m, bp = _choose_grid(batch, target_tile)
    else:
        block_m = _round_up(block_m, 8)
        bp = _round_up(batch, block_m)

    # Pad only the batch axis of x (f32); the feature axis (32) is already the full
    # array extent, which satisfies the BlockSpec last-dim rule.
    xp = x.astype(jnp.float32)
    if bp != batch:
        xp = jnp.pad(xp, ((0, bp - batch), (0, 0)))

    grid = (bp // block_m,)
    out_padded = pl.pallas_call(
        relation_net_kernel,
        out_shape=jax.ShapeDtypeStruct((bp, cp), out_dtype),
        grid=grid,
        in_specs=[
            pl.BlockSpec((block_m, input_dim), lambda i: (i, 0)),  # x tile per step
            pl.BlockSpec((input_dim, hp), lambda i: (0, 0)),       # w1 resident
            pl.BlockSpec((1, hp), lambda i: (0, 0)),               # b1 resident
            pl.BlockSpec((hp, cp), lambda i: (0, 0)),              # w2 resident
            pl.BlockSpec((1, cp), lambda i: (0, 0)),               # b2 resident
        ],
        out_specs=pl.BlockSpec((block_m, cp), lambda i: (i, 0)),
        compiler_params=pltpu.CompilerParams(
            # Batch tiles are independent; even tile count keeps both v7x TCs busy.
            dimension_semantics=("parallel",),
        ),
    )(xp, params.w1p, params.b1p, params.w2p, params.b2p)

    return out_padded[:batch, :num_classes]


def make_relation_net(w1, b1, w2, b2, *, block_m=None, target_tile=1024,
                      out_dtype=jnp.bfloat16):
    """Build a jitted forward that closes over the (already padded/cast) weights."""
    params = prepare_params(w1, b1, w2, b2)
    fwd = functools.partial(relation_net_forward, params=params, block_m=block_m,
                            target_tile=target_tile, out_dtype=out_dtype)
    return jax.jit(fwd)


def init_params(key, input_dim, hidden_dim, num_classes):
    # Deterministic init mimicking nn.Linear default: uniform(-1/sqrt(fan_in), +).
    k1, k2, k3, k4 = jax.random.split(key, 4)
    bound1 = 1.0 / jnp.sqrt(input_dim)
    bound2 = 1.0 / jnp.sqrt(hidden_dim)
    w1 = jax.random.uniform(k1, (input_dim, hidden_dim), jnp.float32, -bound1, bound1)
    b1 = jax.random.uniform(k2, (1, hidden_dim), jnp.float32, -bound1, bound1)
    w2 = jax.random.uniform(k3, (hidden_dim, num_classes), jnp.float32, -bound2, bound2)
    b2 = jax.random.uniform(k4, (1, num_classes), jnp.float32, -bound2, bound2)
    return w1, b1, w2, b2


if __name__ == "__main__":
    # Relation pairs flattened into the batch axis; feature dims stay small and
    # consistent with the module. batch=512 -> 2 even tiles of 256 rows.
    batch, input_dim, hidden_dim, num_classes = 512, 32, 64, 16

    key = jax.random.PRNGKey(0)
    kx, kp = jax.random.split(key)
    x = jax.random.normal(kx, (batch, input_dim), jnp.float32)
    w1, b1, w2, b2 = init_params(kp, input_dim, hidden_dim, num_classes)

    forward = make_relation_net(w1, b1, w2, b2)   # weights padded/cast exactly once
    out = jax.block_until_ready(forward(x))

    # Reference check in plain JAX (f32). bf16 MXU operands, bf16 output and the approx
    # reciprocal loosen accuracy vs. the pure-f32 PyTorch path to ~1e-2 absolute.
    h_ref = jnp.maximum(x @ w1 + b1, 0.0)
    ref = jax.nn.softmax(h_ref @ w2 + b2, axis=1)

    out_f32 = out.astype(jnp.float32)
    assert out.shape == (batch, num_classes)
    assert bool(jnp.all(jnp.isfinite(out_f32)))
    assert jnp.allclose(out_f32, ref, atol=1e-2, rtol=0.0)
    assert jnp.allclose(jnp.sum(out_f32, axis=1), 1.0, atol=1e-2)

    print("KERNEL_OK")
</pallas_src>

<mosaic_0001>
module attributes {stable_mosaic.version = 11 : i64} {
  func.func @relation_net_kernel(%arg0: i32, %arg1: memref<256x32xf32, #tpu.memory_space<vmem>>, %arg2: memref<32x128xbf16, #tpu.memory_space<vmem>>, %arg3: memref<1x128xf32, #tpu.memory_space<vmem>>, %arg4: memref<128x128xbf16, #tpu.memory_space<vmem>>, %arg5: memref<1x128xf32, #tpu.memory_space<vmem>>, %arg6: memref<256x128xbf16, #tpu.memory_space<vmem>>) attributes {dimension_semantics = [#tpu.dimension_semantics<parallel>], iteration_bounds = array<i64: 2>, scalar_prefetch = 0 : i64, scratch_operands = 0 : i64, tpu.core_type = #tpu.core_type<tc>, window_params = [{transform_indices = @transform_0, window_bounds = array<i64: 256, 32>}, {pipeline_mode = #tpu.pipeline_mode<synchronous>, transform_indices = @transform_1, window_bounds = array<i64: 32, 128>}, {pipeline_mode = #tpu.pipeline_mode<synchronous>, transform_indices = @transform_2, window_bounds = array<i64: 1, 128>}, {pipeline_mode = #tpu.pipeline_mode<synchronous>, transform_indices = @transform_3, window_bounds = array<i64: 128, 128>}, {pipeline_mode = #tpu.pipeline_mode<synchronous>, transform_indices = @transform_4, window_bounds = array<i64: 1, 128>}, {transform_indices = @transform_5, window_bounds = array<i64: 256, 128>}]} {
    %c0 = arith.constant 0 : index
    %c0_0 = arith.constant 0 : index
    %0 = vector.load %arg1[%c0, %c0_0] : memref<256x32xf32, #tpu.memory_space<vmem>>, vector<256x32xf32>
    %1 = arith.truncf %0 : vector<256x32xf32> to vector<256x32xbf16>
    %c0_1 = arith.constant 0 : index
    %c0_2 = arith.constant 0 : index
    %2 = vector.load %arg2[%c0_1, %c0_2] : memref<32x128xbf16, #tpu.memory_space<vmem>>, vector<32x128xbf16>
    %cst = arith.constant dense<0.000000e+00> : vector<256x128xf32>
    %3 = tpu.matmul %1, %2, %cst {dimension_numbers = #tpu.dot_dimension_numbers<[1], [0], [0], [1], [0, 0, 1, 1], [], []>} : vector<256x32xbf16>, vector<32x128xbf16>, vector<256x128xf32> -> vector<256x128xf32>
    %c0_3 = arith.constant 0 : index
    %c0_4 = arith.constant 0 : index
    %4 = vector.load %arg3[%c0_3, %c0_4] : memref<1x128xf32, #tpu.memory_space<vmem>>, vector<1x128xf32>
    %5 = vector.broadcast %4 : vector<1x128xf32> to vector<256x128xf32>
    %6 = arith.addf %3, %5 : vector<256x128xf32>
    %cst_5 = arith.constant 0.000000e+00 : f32
    %7 = vector.broadcast %cst_5 : f32 to vector<256x128xf32>
    %8 = arith.maximumf %6, %7 : vector<256x128xf32>
    %9 = arith.truncf %8 : vector<256x128xf32> to vector<256x128xbf16>
    %c0_6 = arith.constant 0 : index
    %c0_7 = arith.constant 0 : index
    %10 = vector.load %arg4[%c0_6, %c0_7] : memref<128x128xbf16, #tpu.memory_space<vmem>>, vector<128x128xbf16>
    %cst_8 = arith.constant dense<0.000000e+00> : vector<256x128xf32>
    %11 = tpu.matmul %9, %10, %cst_8 {dimension_numbers = #tpu.dot_dimension_numbers<[1], [0], [0], [1], [0, 0, 1, 1], [], []>} : vector<256x128xbf16>, vector<128x128xbf16>, vector<256x128xf32> -> vector<256x128xf32>
    %c0_9 = arith.constant 0 : index
    %c0_10 = arith.constant 0 : index
    %12 = vector.load %arg5[%c0_9, %c0_10] : memref<1x128xf32, #tpu.memory_space<vmem>>, vector<1x128xf32>
    %13 = vector.broadcast %12 : vector<1x128xf32> to vector<256x128xf32>
    %14 = arith.addf %11, %13 : vector<256x128xf32>
    %cst_11 = arith.constant dense<0xFF800000> : vector<256xf32>
    %15 = vector.multi_reduction <maximumf>, %14, %cst_11 [1] : vector<256x128xf32> to vector<256xf32>
    %16 = vector.shape_cast %15 : vector<256xf32> to vector<256x1xf32>
    %17 = vector.broadcast %16 : vector<256x1xf32> to vector<256x128xf32>
    %18 = arith.subf %14, %17 : vector<256x128xf32>
    %19 = math.exp %18 : vector<256x128xf32>
    %cst_12 = arith.constant dense<0.000000e+00> : vector<256xf32>
    %20 = vector.multi_reduction <add>, %19, %cst_12 [1] : vector<256x128xf32> to vector<256xf32>
    %21 = vector.shape_cast %20 : vector<256xf32> to vector<256x1xf32>
    %22 = tpu.reciprocal %21 {approx = true} : vector<256x1xf32> -> vector<256x1xf32>
    %23 = vector.broadcast %22 : vector<256x1xf32> to vector<256x128xf32>
    %24 = arith.mulf %19, %23 : vector<256x128xf32>
    %25 = arith.truncf %24 : vector<256x128xf32> to vector<256x128xbf16>
    %c0_13 = arith.constant 0 : index
    %c0_14 = arith.constant 0 : index
    %26 = vector.load %arg6[%c0_13, %c0_14] : memref<256x128xbf16, #tpu.memory_space<vmem>>, vector<256x128xbf16>
    tpu.vector_store %arg6[%c0_13, %c0_14], %25 {strides = array<i32>} : memref<256x128xbf16, #tpu.memory_space<vmem>>, vector<256x128xbf16>,
    return
  }
  func.func @transform_0(%arg0: i32) -> (i32, i32) {
    %c0_i32 = arith.constant 0 : i32
    %c0_i32_0 = arith.constant 0 : i32
    return %arg0, %c0_i32 : i32, i32
  }
  func.func @transform_1(%arg0: i32) -> (i32, i32) {
    %c0_i32 = arith.constant 0 : i32
    %c0_i32_0 = arith.constant 0 : i32
    %c0_i32_1 = arith.constant 0 : i32
    return %c0_i32, %c0_i32_0 : i32, i32
  }
  func.func @transform_2(%arg0: i32) -> (i32, i32) {
    %c0_i32 = arith.constant 0 : i32
    %c0_i32_0 = arith.constant 0 : i32
    %c0_i32_1 = arith.constant 0 : i32
    return %c0_i32, %c0_i32_0 : i32, i32
  }
  func.func @transform_3(%arg0: i32) -> (i32, i32) {
    %c0_i32 = arith.constant 0 : i32
    %c0_i32_0 = arith.constant 0 : i32
    %c0_i32_1 = arith.constant 0 : i32
    return %c0_i32, %c0_i32_0 : i32, i32
  }
  func.func @transform_4(%arg0: i32) -> (i32, i32) {
    %c0_i32 = arith.constant 0 : i32
    %c0_i32_0 = arith.constant 0 : i32
    %c0_i32_1 = arith.constant 0 : i32
    return %c0_i32, %c0_i32_0 : i32, i32
  }
  func.func @transform_5(%arg0: i32) -> (i32, i32) {
    %c0_i32 = arith.constant 0 : i32
    %c0_i32_0 = arith.constant 0 : i32
    return %arg0, %c0_i32 : i32, i32
  }
}

</mosaic_0001>

<bundles_post_ra>
// kernel: relation_net_forward.1
= control target key start
LH: loop header
LB: loop body
LE: loop exit
PB: predicated region body
PF: predicated region fallthrough
CT: control target
= control target key end

     0   :  { %s1818_s18 = smov 0   ;;  %s2267_s0 = inlined_call_operand.vmem [shape: f32[512,32], index: 0, kind: input, shape index: {}]   ;;  %s2268_s1 = inlined_call_operand.vmem [shape: bf16[32,128], index: 1, kind: input, shape index: {}]   ;;  %s2269_s2 = inlined_call_operand.vmem [shape: f32[1,128], index: 2, kind: input, shape index: {}]   ;;  %s2270_s3 = inlined_call_operand.vmem [shape: bf16[128,128], index: 3, kind: input, shape index: {}]   ;;  %s2271_s4 = inlined_call_operand.vmem [shape: f32[1,128], index: 4, kind: input, shape index: {}]   ;;  %s2272_s5 = inlined_call_operand.vmem [shape: bf16[512,128], index: 5, kind: output, shape index: {}]  }
   0x1 LB: > { %s1294_s19 = sadd.s32 4294967295, %s1786_s18   ;;  %p1298_p0 = scmp.ge.s32.totalorder %s1786_s18, 1  ;;  %s1786_s18 = sphi %s1818_s18, %s15_s18  }
   0x2   : > { %p188_p1 = scmp.lt.s32.totalorder %s1786_s18, 3 }
   0x4   : > { %p189_p2 = pnand %p1298_p0, %p188_p1 }
   0x5   : > { %v1642_v0 = vld [vmem:[%s2268_s1] sm:$0xff] (!%p189_p2)   ;;  %s1299_s22 = sshll.u32 (!%p189_p2), %s1294_s19, 5  ;;  %v1643_v1 = vld [vmem:[%s2268_s1 + $0x8] sm:$0xff] (!%p189_p2)   ;;  %v1646_v4 = vld [vmem:[%s2270_s3 + $0x10] sm:$0xff] (!%p189_p2)   ;;  %vm300_vm0 = vcmask (!%p189_p2), 261120  }
   0x6   : > { %192 = sbr.rel (%p189_p2) target bundleno = 835 (0x343), region = 40  ;;  %p217_p3 = scmp.lt.s32.totalorder (!%p189_p2), %s1299_s22, 63  ;;  %1534 = vmatprep.subr.bf16.mxu0 (!%p189_p2), %v1642_v0  ;;  %v1644_v2 = vld [vmem:[%s2270_s3] sm:$0xff] (!%p189_p2)   ;;  %v1645_v3 = vld [vmem:[%s2270_s3 + $0x8] sm:$0xff] (!%p189_p2)   ;;  %v1647_v16 = vld [vmem:[%s2270_s3 + $0x18] sm:$0xff] (!%p189_p2)  }
   0x7   : > { %1535 = vmatpush3.bf16.msra.mxu0 (!%p189_p2), %v1642_v0  ;;  %1618 = vmatprep.subr.bf16.mxu1 (!%p189_p2), %v1644_v2  ;;  %v1648_v21 = vld [vmem:[%s2270_s3 + $0x20] sm:$0xff] (!%p189_p2)   ;;  %v1649_v24 = vld [vmem:[%s2270_s3 + $0x28] sm:$0xff] (!%p189_p2)   ;;  %v1650_v29 = vld [vmem:[%s2270_s3 + $0x30] sm:$0xff] (!%p189_p2)  }
   0x8   : > { %1536 = vmatprep.subr.bf16.mxu0 (!%p189_p2), %v1643_v1  ;;  %1626 = vmatpush3.bf16.msra.mxu1 (!%p189_p2), %v1644_v2  ;;  %v1651_v57 = vld [vmem:[%s2270_s3 + $0x38] sm:$0xff] (!%p189_p2)   ;;  %v1915_v58 = vld [vmem:[%s2269_s2] ss:$0 sm:$0xff] (!%p189_p2) }
   0x9   : > { %1619 = vmatprep.subr.bf16.mxu1 (!%p189_p2), %v1645_v3 }
   0xb   : > { %1537 = vmatpush3.bf16.msra.mxu0 (!%p189_p2), %v1643_v1 }
   0xc   : > { %1570 = vmatprep.subr.bf16.mxu0 (!%p189_p2), %v1644_v2  ;;  %1627 = vmatpush3.bf16.msra.mxu1 (!%p189_p2), %v1645_v3 }
   0xd   : > { %s2274_s22 = smov (!%p217_p3, %s1299_s22), 63  ;;  %1620 = vmatprep.subr.bf16.mxu1 %v1646_v4 }
   0xe   : > { %s1300_s29 = sshll.u32 %s2274_s22, 3  ;;  %s1302_s26 = sshll.u32 %s2274_s22, 2 }
   0xf   : > { %s1844_s7 = scalar_lea.vmem %s2267_s0, %s1300_s29  ;;  %s2216_s29 = scalar_lea.vmem %s2272_s5, %s1302_s26 }
  0x10   : > { %v229_v5 = vld [vmem:[%s1844_s7] sm:$0xff]  ;;  %v230_v6 = vld [vmem:[%s1844_s7 + $0x8] sm:$0xff]  ;;  %v231_v7 = vld [vmem:[%s1844_s7 + $0x10] sm:$0xff]  ;;  %1628 = vmatpush3.bf16.msra.mxu1 %v1646_v4 }
  0x11   : > { %v261_v8 = vpack.c.bf16 %v230_v6, %v229_v5  ;;  %v232_v9 = vld [vmem:[%s1844_s7 + $0x18] sm:$0xff]  ;;  %v233_v10 = vld [vmem:[%s1844_s7 + $0x20] sm:$0xff]  ;;  %v234_v11 = vld [vmem:[%s1844_s7 + $0x28] sm:$0xff]  ;;  %1621 = vmatprep.subr.bf16.mxu1 %v1647_v16 }
  0x12   : > { %v262_v12 = vpack.c.bf16 %v232_v9, %v231_v7  ;;  %v263_v13 = vpack.c.bf16 %v234_v11, %v233_v10  ;;  %v235_v14 = vld [vmem:[%s1844_s7 + $0x30] sm:$0xff]  ;;  %v236_v15 = vld [vmem:[%s1844_s7 + $0x38] sm:$0xff]  ;;  %v237_v17 = vld [vmem:[%s1844_s7 + $0x40] sm:$0xff] }
  0x13   : > { %1538 = vmatprep.mubr.msk.bf16.mxu0 %vm300_vm0, %v261_v8  ;;  %v238_v18 = vld [vmem:[%s1844_s7 + $0x48] sm:$0xff]  ;;  %v264_v19 = vpack.c.bf16 %v236_v15, %v235_v14  ;;  %v239_v22 = vld [vmem:[%s1844_s7 + $0x50] sm:$0xff]  ;;  %v240_v23 = vld [vmem:[%s1844_s7 + $0x58] sm:$0xff] }
  0x14   : > { %1539 = vmatmul.mubr.msk.bf16.vlgmr.msra.gmra.mrb[0].mxu0 %vm300_vm0, %v262_v12  ;;  %v265_v20 = vpack.c.bf16 %v238_v18, %v237_v17  ;;  %1629 = vmatpush3.bf16.msra.mxu1 %v1647_v16  ;;  %v241_v25 = vld [vmem:[%s1844_s7 + $0x60] sm:$0xff]  ;;  %v242_v26 = vld [vmem:[%s1844_s7 + $0x68] sm:$0xff]  ;;  %v266_v27 = vpack.c.bf16 %v240_v23, %v239_v22  ;;  %v243_v30 = vld [vmem:[%s1844_s7 + $0x70] sm:$0xff] }
  0x15   : > { %1542 = vmatprep.mubr.msk.bf16.mxu0 %vm300_vm0, %v263_v13  ;;  %1571 = vmatpush3.bf16.msra.mxu0 %v1644_v2  ;;  %v267_v28 = vpack.c.bf16 %v242_v26, %v241_v25  ;;  %v244_v31 = vld [vmem:[%s1844_s7 + $0x78] sm:$0xff]  ;;  %v245_v32 = vld [vmem:[%s1844_s7 + $0x80] sm:$0xff]  ;;  %v246_v33 = vld [vmem:[%s1844_s7 + $0x88] sm:$0xff] }
  0x16   : > { %1572 = vmatprep.subr.bf16.mxu0 %v1645_v3  ;;  %1622 = vmatprep.subr.bf16.mxu1 %v1648_v21  ;;  %v268_v34 = vpack.c.bf16 %v244_v31, %v243_v30  ;;  %v269_v35 = vpack.c.bf16 %v246_v33, %v245_v32  ;;  %v247_v36 = vld [vmem:[%s1844_s7 + $0x90] sm:$0xff]  ;;  %v248_v37 = vld [vmem:[%s1844_s7 + $0x98] sm:$0xff]  ;;  %v249_v38 = vld [vmem:[%s1844_s7 + $0xa0] sm:$0xff] }
  0x17   : > { %v250_v39 = vld [vmem:[%s1844_s7 + $0xa8] sm:$0xff]  ;;  %v270_v40 = vpack.c.bf16 %v248_v37, %v247_v36  ;;  %v251_v42 = vld [vmem:[%s1844_s7 + $0xb0] sm:$0xff]  ;;  %v252_v43 = vld [vmem:[%s1844_s7 + $0xb8] sm:$0xff] }
  0x18   : > { %1630 = vmatpush3.bf16.msra.mxu1 %v1648_v21  ;;  %v271_v41 = vpack.c.bf16 %v250_v39, %v249_v38  ;;  %v253_v44 = vld [vmem:[%s1844_s7 + $0xc0] sm:$0xff]  ;;  %v254_v45 = vld [vmem:[%s1844_s7 + $0xc8] sm:$0xff]  ;;  %v272_v46 = vpack.c.bf16 %v252_v43, %v251_v42  ;;  %v255_v48 = vld [vmem:[%s1844_s7 + $0xd0] sm:$0xff] }
  0x19   : > { %1573 = vmatpush3.bf16.msra.mxu0 %v1645_v3  ;;  %1623 = vmatprep.subr.bf16.mxu1 %v1649_v24  ;;  %v273_v47 = vpack.c.bf16 %v254_v45, %v253_v44  ;;  %v256_v49 = vld [vmem:[%s1844_s7 + $0xd8] sm:$0xff]  ;;  %v257_v50 = vld [vmem:[%s1844_s7 + $0xe0] sm:$0xff]  ;;  %v258_v51 = vld [vmem:[%s1844_s7 + $0xe8] sm:$0xff] }
  0x1a   : > { %1574 = vmatprep.subr.bf16.mxu0 %v1646_v4  ;;  %v274_v52 = vpack.c.bf16 %v256_v49, %v255_v48  ;;  %v275_v53 = vpack.c.bf16 %v258_v51, %v257_v50  ;;  %v259_v54 = vld [vmem:[%s1844_s7 + $0xf0] sm:$0xff]  ;;  %v260_v55 = vld [vmem:[%s1844_s7 + $0xf8] sm:$0xff] }
  0x1b   : > { %v276_v56 = vpack.c.bf16 %v260_v55, %v259_v54 }
  0x1c   : > { %1543 = vmatmul.mubr.msk.bf16.gmra.mrb[4].mxu0 %vm300_vm0, %v264_v19  ;;  %1631 = vmatpush3.bf16.msra.mxu1 %v1649_v24 }
  0x1d   : > { %1546 = vmatprep.mubr.msk.bf16.mxu0 %vm300_vm0, %v265_v20  ;;  %1575 = vmatpush3.bf16.msra.mxu0 %v1646_v4 }
  0x1e   : > { %1576 = vmatprep.subr.bf16.mxu0 %v1647_v16  ;;  %1624 = vmatprep.subr.bf16.mxu1 %v1650_v29 }
  0x20   : > { %1632 = vmatpush3.bf16.msra.mxu1 %v1650_v29 }
  0x21   : > { %1577 = vmatpush3.bf16.msra.mxu0 %v1647_v16  ;;  %1625 = vmatprep.subr.bf16.mxu1 %v1651_v57 }
  0x22   : > { %1578 = vmatprep.subr.bf16.mxu0 %v1648_v21 }
  0x24   : > { %1547 = vmatmul.mubr.msk.bf16.gmra.mrb[8].mxu0 %vm300_vm0, %v266_v27  ;;  %1633 = vmatpush3.bf16.msra.mxu1 %v1651_v57 }
  0x25   : > { %1550 = vmatprep.mubr.msk.bf16.mxu0 %vm300_vm0, %v267_v28  ;;  %1579 = vmatpush3.bf16.msra.mxu0 %v1648_v21 }
  0x26   : > { %1580 = vmatprep.subr.bf16.mxu0 %v1649_v24 }
  0x29   : > { %1581 = vmatpush3.bf16.msra.mxu0 %v1649_v24 }
  0x2a   : > { %1582 = vmatprep.subr.bf16.mxu0 %v1650_v29 }
  0x2c   : > { %1551 = vmatmul.mubr.msk.bf16.gmra.mrb[12].mxu0 %vm300_vm0, %v268_v34 }
  0x2d   : > { %1554 = vmatprep.mubr.msk.bf16.mxu0 %vm300_vm0, %v269_v35  ;;  %1583 = vmatpush3.bf16.msra.mxu0 %v1650_v29 }
  0x2e   : > { %1584 = vmatprep.subr.bf16.mxu0 %v1651_v57 }
  0x31   : > { %1585 = vmatpush3.bf16.msra.mxu0 %v1651_v57 }
  0x34   : > { %1555 = vmatmul.mubr.msk.bf16.gmra.mrb[16].mxu0 %vm300_vm0, %v270_v40 }
  0x35   : > { %1558 = vmatprep.mubr.msk.bf16.mxu0 %vm300_vm0, %v271_v41 }
  0x3c   : > { %1559 = vmatmul.mubr.msk.bf16.gmra.mrb[20].mxu0 %vm300_vm0, %v272_v46 }
  0x3d   : > { %1562 = vmatprep.mubr.msk.bf16.mxu0 %vm300_vm0, %v273_v47 }
  0x44   : > { %1563 = vmatmul.mubr.msk.bf16.gmra.mrb[24].mxu0 %vm300_vm0, %v274_v52 }
  0x45   : > { %1566 = vmatprep.mubr.msk.bf16.mxu0 %vm300_vm0, %v275_v53 }
  0x4c   : > { %1567 = vmatmul.mubr.msk.bf16.gmra.mrb[28].mxu0 %vm300_vm0, %v276_v56 }
  0xe7   : > { %v1540_v59 = vpop.f32.mrb[0].mxu0 }
  0xe8   : > { %v392_v60 = vadd.f32 %v1540_v59, %v1915_v58  ;;  %v383_v61 = vpop.f32.mrb[1].mxu0 }
  0xe9   : > { %v384_v62 = vadd.f32 %v1915_v58, %v383_v61  ;;  %v1541_v63 = vpop.f32.mrb[2].mxu0 }
  0xea   : > { %v395_v0 = vadd.f32 %v1541_v63, %v1915_v58  ;;  %v386_v1 = vpop.f32.mrb[3].mxu0  ;;  %v512_v3 = vmax.f32 %v392_v60, 0.0 }
  0xeb   : > { %v387_v2 = vadd.f32 %v1915_v58, %v386_v1  ;;  %v510_v5 = vmax.f32 %v384_v62, 0.0 }
  0xec   : > { %v513_v4 = vmax.f32 %v395_v0, 0.0 }
  0xed   : > { %v511_v6 = vmax.f32 %v387_v2, 0.0 }
  0xee   : > { %v543_v7 = vpack.c.bf16 %v513_v4, %v512_v3 }
  0xef   : > { %v542_v8 = vpack.c.bf16 %v511_v6, %v510_v5  ;;  %v1544_v9 = vpop.f32.mrb[4].mxu0 }
  0xf0   : > { %v408_v10 = vadd.f32 %v1544_v9, %v1915_v58  ;;  %v399_v11 = vpop.f32.mrb[5].mxu0 }
  0xf1   : > { %v400_v12 = vadd.f32 %v1915_v58, %v399_v11  ;;  %v1545_v13 = vpop.f32.mrb[6].mxu0  ;;  %1586 = vmatprep.mubr.bf16.mxu0 %v542_v8 }
  0xf2   : > { %v516_v14 = vmax.f32 %v408_v10, 0.0  ;;  %v411_v15 = vadd.f32 %v1545_v13, %v1915_v58  ;;  %v402_v16 = vpop.f32.mrb[7].mxu0  ;;  %1587 = vmatmul.mubr.bf16.vlgmr.msra.gmra.mrb[32].mxu0 %v543_v7 }
  0xf3   : > { %v403_v17 = vadd.f32 %v1915_v58, %v402_v16  ;;  %v514_v19 = vmax.f32 %v400_v12, 0.0 }
  0xf4   : > { %v517_v18 = vmax.f32 %v411_v15, 0.0 }
  0xf5   : > { %v515_v20 = vmax.f32 %v403_v17, 0.0 }
  0xf6   : > { %v545_v21 = vpack.c.bf16 %v517_v18, %v516_v14 }
  0xf7   : > { %v1548_v22 = vpop.f32.mrb[8].mxu0  ;;  %v544_v23 = vpack.c.bf16 %v515_v20, %v514_v19 }
  0xf8   : > { %v424_v24 = vadd.f32 %v1548_v22, %v1915_v58  ;;  %v415_v25 = vpop.f32.mrb[9].mxu0 }
  0xf9   : > { %v416_v26 = vadd.f32 %v1915_v58, %v415_v25  ;;  %v1549_v27 = vpop.f32.mrb[10].mxu0  ;;  %1590 = vmatprep.mubr.bf16.mxu1 %v544_v23 }
  0xfa   : > { %v520_v28 = vmax.f32 %v424_v24, 0.0  ;;  %v427_v29 = vadd.f32 %v1549_v27, %v1915_v58  ;;  %v418_v30 = vpop.f32.mrb[11].mxu0  ;;  %1591 = vmatmul.mubr.bf16.vlgmr.msra.gmra.mrb[0].mxu1 %v545_v21 }
  0xfb   : > { %v419_v31 = vadd.f32 %v1915_v58, %v418_v30  ;;  %v518_v33 = vmax.f32 %v416_v26, 0.0 }
  0xfc   : > { %v521_v32 = vmax.f32 %v427_v29, 0.0 }
  0xfd   : > { %v519_v34 = vmax.f32 %v419_v31, 0.0 }
  0xfe   : > { %v547_v35 = vpack.c.bf16 %v521_v32, %v520_v28 }
  0xff   : > { %v546_v36 = vpack.c.bf16 %v519_v34, %v518_v33  ;;  %v1552_v37 = vpop.f32.mrb[12].mxu0 }
 0x100   : > { %v440_v38 = vadd.f32 %v1552_v37, %v1915_v58  ;;  %v431_v39 = vpop.f32.mrb[13].mxu0 }
 0x101   : > { %v432_v40 = vadd.f32 %v1915_v58, %v431_v39  ;;  %v1553_v41 = vpop.f32.mrb[14].mxu0  ;;  %1594 = vmatprep.mubr.bf16.mxu1 %v546_v36 }
 0x102   : > { %v524_v42 = vmax.f32 %v440_v38, 0.0  ;;  %v443_v43 = vadd.f32 %v1553_v41, %v1915_v58  ;;  %v434_v44 = vpop.f32.mrb[15].mxu0  ;;  %1595 = vmatmul.mubr.bf16.gmra.mrb[4].mxu1 %v547_v35 }
 0x103   : > { %v435_v45 = vadd.f32 %v1915_v58, %v434_v44  ;;  %v522_v47 = vmax.f32 %v432_v40, 0.0  ;;  %v1952_v44 = vld [vmem:[%s2271_s4] ss:$0 sm:$0xff] }
 0x104   : > { %v525_v46 = vmax.f32 %v443_v43, 0.0 }
 0x105   : > { %v523_v48 = vmax.f32 %v435_v45, 0.0 }
 0x106   : > { %v549_v49 = vpack.c.bf16 %v525_v46, %v524_v42 }
 0x107   : > { %v548_v50 = vpack.c.bf16 %v523_v48, %v522_v47  ;;  %v1556_v51 = vpop.f32.mrb[16].mxu0 }
 0x108   : > { %v456_v52 = vadd.f32 %v1556_v51, %v1915_v58  ;;  %v447_v53 = vpop.f32.mrb[17].mxu0 }
 0x109   : > { %v448_v54 = vadd.f32 %v1915_v58, %v447_v53  ;;  %v1557_v55 = vpop.f32.mrb[18].mxu0  ;;  %1598 = vmatprep.mubr.bf16.mxu1 %v548_v50 }
 0x10a   : > { %v528_v56 = vmax.f32 %v456_v52, 0.0  ;;  %v459_v57 = vadd.f32 %v1557_v55, %v1915_v58  ;;  %v450_v59 = vpop.f32.mrb[19].mxu0  ;;  %1599 = vmatmul.mubr.bf16.gmra.mrb[8].mxu1 %v549_v49 }
 0x10b   : > { %v451_v60 = vadd.f32 %v1915_v58, %v450_v59  ;;  %v526_v62 = vmax.f32 %v448_v54, 0.0 }
 0x10c   : > { %v529_v61 = vmax.f32 %v459_v57, 0.0 }
 0x10d   : > { %v527_v63 = vmax.f32 %v451_v60, 0.0 }
 0x10e   : > { %v551_v0 = vpack.c.bf16 %v529_v61, %v528_v56 }
 0x10f   : > { %v550_v1 = vpack.c.bf16 %v527_v63, %v526_v62  ;;  %v1560_v2 = vpop.f32.mrb[20].mxu0 }
 0x110   : > { %v472_v3 = vadd.f32 %v1560_v2, %v1915_v58  ;;  %v463_v4 = vpop.f32.mrb[21].mxu0 }
 0x111   : > { %v464_v5 = vadd.f32 %v1915_v58, %v463_v4  ;;  %v1561_v6 = vpop.f32.mrb[22].mxu0  ;;  %1602 = vmatprep.mubr.bf16.mxu1 %v550_v1 }
 0x112   : > { %v532_v7 = vmax.f32 %v472_v3, 0.0  ;;  %v475_v8 = vadd.f32 %v1561_v6, %v1915_v58  ;;  %v466_v9 = vpop.f32.mrb[23].mxu0  ;;  %1603 = vmatmul.mubr.bf16.gmra.mrb[12].mxu1 %v551_v0 }
 0x113   : > { %v467_v10 = vadd.f32 %v1915_v58, %v466_v9  ;;  %v530_v12 = vmax.f32 %v464_v5, 0.0 }
 0x114   : > { %v533_v11 = vmax.f32 %v475_v8, 0.0 }
 0x115   : > { %v531_v13 = vmax.f32 %v467_v10, 0.0 }
 0x116   : > { %v553_v14 = vpack.c.bf16 %v533_v11, %v532_v7 }
 0x117   : > { %v552_v15 = vpack.c.bf16 %v531_v13, %v530_v12  ;;  %v1564_v16 = vpop.f32.mrb[24].mxu0 }
 0x118   : > { %v488_v17 = vadd.f32 %v1564_v16, %v1915_v58  ;;  %v479_v18 = vpop.f32.mrb[25].mxu0 }
 0x119   : > { %v480_v19 = vadd.f32 %v1915_v58, %v479_v18  ;;  %v1565_v20 = vpop.f32.mrb[26].mxu0  ;;  %1606 = vmatprep.mubr.bf16.mxu1 %v552_v15 }
 0x11a   : > { %v536_v21 = vmax.f32 %v488_v17, 0.0  ;;  %v491_v22 = vadd.f32 %v1565_v20, %v1915_v58  ;;  %v482_v23 = vpop.f32.mrb[27].mxu0  ;;  %1607 = vmatmul.mubr.bf16.gmra.mrb[16].mxu1 %v553_v14 }
 0x11b   : > { %v483_v24 = vadd.f32 %v1915_v58, %v482_v23  ;;  %v534_v26 = vmax.f32 %v480_v19, 0.0 }
 0x11c   : > { %v537_v25 = vmax.f32 %v491_v22, 0.0 }
 0x11d   : > { %v535_v27 = vmax.f32 %v483_v24, 0.0 }
 0x11e   : > { %v555_v28 = vpack.c.bf16 %v537_v25, %v536_v21 }
 0x11f   : > { %v554_v29 = vpack.c.bf16 %v535_v27, %v534_v26  ;;  %v1568_v30 = vpop.f32.mrb[28].mxu0 }
 0x120   : > { %v504_v31 = vadd.f32 %v1568_v30, %v1915_v58  ;;  %v495_v32 = vpop.f32.mrb[29].mxu0 }
 0x121   : > { %v496_v33 = vadd.f32 %v1915_v58, %v495_v32  ;;  %v1569_v34 = vpop.f32.mrb[30].mxu0  ;;  %1610 = vmatprep.mubr.bf16.mxu1 %v554_v29 }
 0x122   : > { %v540_v35 = vmax.f32 %v504_v31, 0.0  ;;  %v507_v36 = vadd.f32 %v1569_v34, %v1915_v58  ;;  %v498_v37 = vpop.f32.mrb[31].mxu0  ;;  %1611 = vmatmul.mubr.bf16.gmra.mrb[20].mxu1 %v555_v28 }
 0x123   : > { %v499_v38 = vadd.f32 %v1915_v58, %v498_v37  ;;  %v538_v40 = vmax.f32 %v496_v33, 0.0 }
 0x124   : > { %v541_v39 = vmax.f32 %v507_v36, 0.0 }
 0x125   : > { %v539_v41 = vmax.f32 %v499_v38, 0.0 }
 0x126   : > { %v557_v42 = vpack.c.bf16 %v541_v39, %v540_v35 }
 0x127   : > { %v556_v43 = vpack.c.bf16 %v539_v41, %v538_v40 }
 0x129   : > { %1614 = vmatprep.mubr.bf16.mxu1 %v556_v43 }
 0x12a   : > { %1615 = vmatmul.mubr.bf16.gmra.mrb[24].mxu1 %v557_v42 }
 0x1c5   : > { %v1588_v45 = vpop.f32.mrb[32].mxu0 }
 0x1c6   : > { %v1955_v46 = vadd.f32 %v1588_v45, %v1952_v44  ;;  %v663_v47 = vpop.f32.mrb[33].mxu0 }
 0x1c7   : > { %v1958_v48 = vadd.f32 %v1952_v44, %v663_v47  ;;  %v1589_v58 = vpop.f32.mrb[34].mxu0 }
 0x1c8   : > { %794 = vmax.xlane.f32.xlu1 %v1955_v46  ;;  %v666_v49 = vpop.f32.mrb[35].mxu0  ;;  %v1963_v50 = vadd.f32 %v1589_v58, %v1952_v44 }
 0x1c9   : > { %790 = vmax.xlane.f32.xlu0 %v1958_v48  ;;  %v1966_v51 = vadd.f32 %v1952_v44, %v666_v49 }
 0x1cc   : > { %796 = vmax.xlane.f32.xlu1 %v1963_v50 }
 0x1cd   : > { %v1592_v52 = vpop.f32.mrb[0].mxu1  ;;  %792 = vmax.xlane.f32.xlu0 %v1966_v51 }
 0x1ce   : > { %v1971_v53 = vadd.f32 %v1592_v52, %v1952_v44  ;;  %v679_v54 = vpop.f32.mrb[1].mxu1 }
 0x1cf   : > { %v1593_v55 = vpop.f32.mrb[2].mxu1  ;;  %v1979_v59 = vadd.f32 %v1952_v44, %v679_v54 }
 0x1d0   : > { %v1974_v56 = vadd.f32 %v1593_v55, %v1952_v44  ;;  %v682_v57 = vpop.f32.mrb[3].mxu1 }
 0x1d1   : > { %802 = vmax.xlane.f32.xlu0 %v1971_v53  ;;  %v1982_v60 = vadd.f32 %v1952_v44, %v682_v57 }
 0x1d2   : > { %804 = vmax.xlane.f32.xlu1 %v1974_v56 }
 0x1d5   : > { %v1596_v61 = vpop.f32.mrb[4].mxu1  ;;  %798 = vmax.xlane.f32.xlu0 %v1979_v59 }
 0x1d6   : > { %v1986_v62 = vadd.f32 %v1596_v61, %v1952_v44  ;;  %v695_v63 = vpop.f32.mrb[5].mxu1  ;;  %800 = vmax.xlane.f32.xlu1 %v1982_v60 }
 0x1d7   : > { %v1597_v0 = vpop.f32.mrb[6].mxu1  ;;  %v1995_v3 = vadd.f32 %v1952_v44, %v695_v63 }
 0x1d8   : > { %v1990_v1 = vadd.f32 %v1597_v0, %v1952_v44  ;;  %v698_v2 = vpop.f32.mrb[7].mxu1 }
 0x1d9   : > { %810 = vmax.xlane.f32.xlu0 %v1986_v62  ;;  %v1998_v4 = vadd.f32 %v1952_v44, %v698_v2 }
 0x1da   : > { %812 = vmax.xlane.f32.xlu1 %v1990_v1 }
 0x1dd   : > { %v1600_v5 = vpop.f32.mrb[8].mxu1  ;;  %806 = vmax.xlane.f32.xlu0 %v1995_v3 }
 0x1de   : > { %v2002_v6 = vadd.f32 %v1600_v5, %v1952_v44  ;;  %v711_v7 = vpop.f32.mrb[9].mxu1  ;;  %808 = vmax.xlane.f32.xlu1 %v1998_v4 }
 0x1df   : > { %v1601_v8 = vpop.f32.mrb[10].mxu1  ;;  %v2011_v11 = vadd.f32 %v1952_v44, %v711_v7 }
 0x1e0   : > { %v2006_v9 = vadd.f32 %v1601_v8, %v1952_v44  ;;  %v714_v10 = vpop.f32.mrb[11].mxu1 }
 0x1e1   : > { %818 = vmax.xlane.f32.xlu0 %v2002_v6  ;;  %v2014_v12 = vadd.f32 %v1952_v44, %v714_v10 }
 0x1e2   : > { %820 = vmax.xlane.f32.xlu1 %v2006_v9 }
 0x1e5   : > { %v1604_v13 = vpop.f32.mrb[12].mxu1  ;;  %814 = vmax.xlane.f32.xlu0 %v2011_v11 }
 0x1e6   : > { %v2018_v14 = vadd.f32 %v1604_v13, %v1952_v44  ;;  %v727_v15 = vpop.f32.mrb[13].mxu1  ;;  %816 = vmax.xlane.f32.xlu1 %v2014_v12 }
 0x1e7   : > { %v1605_v16 = vpop.f32.mrb[14].mxu1  ;;  %v2027_v19 = vadd.f32 %v1952_v44, %v727_v15 }
 0x1e8   : > { %v2022_v17 = vadd.f32 %v1605_v16, %v1952_v44  ;;  %v730_v18 = vpop.f32.mrb[15].mxu1 }
 0x1e9   : > { %826 = vmax.xlane.f32.xlu0 %v2018_v14  ;;  %v2030_v20 = vadd.f32 %v1952_v44, %v730_v18 }
 0x1ea   : > { %828 = vmax.xlane.f32.xlu1 %v2022_v17 }
 0x1ed   : > { %v1608_v21 = vpop.f32.mrb[16].mxu1  ;;  %822 = vmax.xlane.f32.xlu0 %v2027_v19 }
 0x1ee   : > { %v2034_v22 = vadd.f32 %v1608_v21, %v1952_v44  ;;  %v743_v23 = vpop.f32.mrb[17].mxu1  ;;  %824 = vmax.xlane.f32.xlu1 %v2030_v20 }
 0x1ef   : > { %v1609_v24 = vpop.f32.mrb[18].mxu1  ;;  %v2043_v27 = vadd.f32 %v1952_v44, %v743_v23 }
 0x1f0   : > { %v2038_v25 = vadd.f32 %v1609_v24, %v1952_v44  ;;  %v746_v26 = vpop.f32.mrb[19].mxu1 }
 0x1f1   : > { %834 = vmax.xlane.f32.xlu0 %v2034_v22  ;;  %v2046_v28 = vadd.f32 %v1952_v44, %v746_v26 }
 0x1f2   : > { %836 = vmax.xlane.f32.xlu1 %v2038_v25 }
 0x1f5   : > { %v1612_v29 = vpop.f32.mrb[20].mxu1  ;;  %830 = vmax.xlane.f32.xlu0 %v2043_v27 }
 0x1f6   : > { %v2050_v30 = vadd.f32 %v1612_v29, %v1952_v44  ;;  %v759_v31 = vpop.f32.mrb[21].mxu1  ;;  %832 = vmax.xlane.f32.xlu1 %v2046_v28 }
 0x1f7   : > { %v1613_v32 = vpop.f32.mrb[22].mxu1  ;;  %v2059_v35 = vadd.f32 %v1952_v44, %v759_v31 }
 0x1f8   : > { %v2054_v33 = vadd.f32 %v1613_v32, %v1952_v44  ;;  %v762_v34 = vpop.f32.mrb[23].mxu1 }
 0x1f9   : > { %842 = vmax.xlane.f32.xlu0 %v2050_v30  ;;  %v2062_v36 = vadd.f32 %v1952_v44, %v762_v34 }
 0x1fa   : > { %844 = vmax.xlane.f32.xlu1 %v2054_v33 }
 0x1fd   : > { %v1616_v37 = vpop.f32.mrb[24].mxu1  ;;  %838 = vmax.xlane.f32.xlu0 %v2059_v35 }
 0x1fe   : > { %v775_v38 = vpop.f32.mrb[25].mxu1  ;;  %840 = vmax.xlane.f32.xlu1 %v2062_v36  ;;  %v2074_v43 = vadd.f32 %v1616_v37, %v1952_v44 }
 0x1ff   : > { %v2067_v39 = vadd.f32 %v1952_v44, %v775_v38  ;;  %v1617_v40 = vpop.f32.mrb[26].mxu1 }
 0x200   : > { %v778_v41 = vpop.f32.mrb[27].mxu1  ;;  %v2078_v45 = vadd.f32 %v1617_v40, %v1952_v44 }
 0x201   : > { %v2070_v42 = vadd.f32 %v1952_v44, %v778_v41  ;;  %846 = vmax.xlane.f32.xlu0 %v2067_v39 }
 0x203   : > { %848 = vmax.xlane.f32.xlu1 %v2070_v42 }
 0x205   : > { %850 = vmax.xlane.f32.xlu0 %v2074_v43 }
 0x207   : > { %852 = vmax.xlane.f32.xlu1 %v2078_v45 }
 0x255   : > { %v795_v47 = vpop.xlane.xlu1 %794 }
 0x256   : > { %v856_v58 = vsub.f32 %v1955_v46, %v795_v47  ;;  %v791_v49 = vpop.xlane.xlu0 %790 }
 0x257   : > { %v854_v52 = vsub.f32 %v1958_v48, %v791_v49 }
 0x258   : > { %v890_v54 = vmul.f32 1.442695, %v856_v58 }
 0x259   : > { %v886_v55 = vmul.f32 1.442695, %v854_v52  ;;  %v797_v57 = vpop.xlane.xlu1 %796 }
 0x25a   : > { %1652 = vpow2.f32 %v890_v54  ;;  %v857_v61 = vsub.f32 %v1963_v50, %v797_v57  ;;  %v793_v63 = vpop.xlane.xlu0 %792 }
 0x25b   : > { %v855_v44 = vsub.f32 %v1966_v51, %v793_v63  ;;  %1654 = vpow2.f32 %v886_v55 }
 0x25c   : > { %v892_v0 = vmul.f32 1.442695, %v857_v61 }
 0x25d   : > { %v888_v2 = vmul.f32 1.442695, %v855_v44 }
 0x25e   : > { %1656 = vpow2.f32 %v892_v0  ;;  %v803_v5 = vpop.xlane.xlu0 %802 }
 0x25f   : > { %v860_v7 = vsub.f32 %v1971_v53, %v803_v5  ;;  %v805_v46 = vpop.xlane.xlu1 %804  ;;  %1658 = vpow2.f32 %v888_v2 }
 0x260   : > { %v861_v8 = vsub.f32 %v1974_v56, %v805_v46 }
 0x261   : > { %v898_v48 = vmul.f32 1.442695, %v860_v7 }
 0x262   : > { %v900_v10 = vmul.f32 1.442695, %v861_v8  ;;  %v799_v13 = vpop.xlane.xlu0 %798 }
 0x263   : > { %1660 = vpow2.f32 %v898_v48  ;;  %v858_v50 = vsub.f32 %v1979_v59, %v799_v13  ;;  %v801_v15 = vpop.xlane.xlu1 %800 }
 0x264   : > { %v2089_v16 = vpop.eup %1652  ;;  %v859_v51 = vsub.f32 %v1982_v60, %v801_v15  ;;  %1662 = vpow2.f32 %v900_v10 }
 0x265   : > { %v894_v18 = vmul.f32 1.442695, %v858_v50  ;;  %954 = vadd.xlane.f32.xlu0 %v2089_v16  ;;  %v2093_v23 = vpop.eup %1654 }
 0x266   : > { %v896_v53 = vmul.f32 1.442695, %v859_v51  ;;  %v811_v21 = vpop.xlane.xlu0 %810 }
 0x267   : > { %1664 = vpow2.f32 %v894_v18  ;;  %v864_v56 = vsub.f32 %v1986_v62, %v811_v21  ;;  %v813_v24 = vpop.xlane.xlu1 %812 }
 0x268   : > { %v2096_v26 = vpop.eup %1656  ;;  %v865_v59 = vsub.f32 %v1990_v1, %v813_v24  ;;  %1666 = vpow2.f32 %v896_v53 }
 0x269   : > { %v906_v29 = vmul.f32 1.442695, %v864_v56  ;;  %956 = vadd.xlane.f32.xlu1 %v2096_v26  ;;  %950 = vadd.xlane.f32.xlu0 %v2093_v23  ;;  %v2102_v37 = vpop.eup %1658 }
 0x26a   : > { %v908_v60 = vmul.f32 1.442695, %v865_v59  ;;  %v807_v31 = vpop.xlane.xlu0 %806 }
 0x26b   : > { %1668 = vpow2.f32 %v906_v29  ;;  %v862_v32 = vsub.f32 %v1995_v3, %v807_v31  ;;  %v809_v34 = vpop.xlane.xlu1 %808 }
 0x26c   : > { %v863_v62 = vsub.f32 %v1998_v4, %v809_v34  ;;  %1670 = vpow2.f32 %v908_v60 }
 0x26d   : > { %v2105_v38 = vpop.eup %1660  ;;  %v902_v40 = vmul.f32 1.442695, %v862_v32  ;;  %952 = vadd.xlane.f32.xlu1 %v2102_v37 }
 0x26e   : > { %v904_v1 = vmul.f32 1.442695, %v863_v62  ;;  %962 = vadd.xlane.f32.xlu0 %v2105_v38  ;;  %v819_v41 = vpop.xlane.xlu0 %818  ;;  %v2110_v3 = vpop.eup %1662 }
 0x26f   : > { %1672 = vpow2.f32 %v902_v40  ;;  %v868_v47 = vsub.f32 %v2002_v6, %v819_v41  ;;  %v821_v58 = vpop.xlane.xlu1 %820 }
 0x270   : > { %v869_v49 = vsub.f32 %v2006_v9, %v821_v58  ;;  %1674 = vpow2.f32 %v904_v1 }
 0x271   : > { %v2113_v52 = vpop.eup %1664  ;;  %v914_v4 = vmul.f32 1.442695, %v868_v47  ;;  %964 = vadd.xlane.f32.xlu1 %v2110_v3 }
 0x272   : > { %v916_v54 = vmul.f32 1.442695, %v869_v49  ;;  %958 = vadd.xlane.f32.xlu0 %v2113_v52  ;;  %v815_v55 = vpop.xlane.xlu0 %814  ;;  %v2118_v6 = vpop.eup %1666 }
 0x273   : > { %1676 = vpow2.f32 %v914_v4  ;;  %v866_v57 = vsub.f32 %v2011_v11, %v815_v55  ;;  %v817_v61 = vpop.xlane.xlu1 %816 }
 0x274   : > { %v867_v63 = vsub.f32 %v2014_v12, %v817_v61  ;;  %1678 = vpow2.f32 %v916_v54 }
 0x275   : > { %v2121_v44 = vpop.eup %1668  ;;  %v910_v9 = vmul.f32 1.442695, %v866_v57  ;;  %960 = vadd.xlane.f32.xlu1 %v2118_v6 }
 0x276   : > { %v912_v0 = vmul.f32 1.442695, %v867_v63  ;;  %970 = vadd.xlane.f32.xlu0 %v2121_v44  ;;  %v827_v2 = vpop.xlane.xlu0 %826  ;;  %v2126_v11 = vpop.eup %1670 }
 0x277   : > { %1680 = vpow2.f32 %v910_v9  ;;  %v872_v5 = vsub.f32 %v2018_v14, %v827_v2  ;;  %v829_v7 = vpop.xlane.xlu1 %828 }
 0x278   : > { %v873_v46 = vsub.f32 %v2022_v17, %v829_v7  ;;  %1682 = vpow2.f32 %v912_v0 }
 0x279   : > { %v2129_v8 = vpop.eup %1672  ;;  %v922_v12 = vmul.f32 1.442695, %v872_v5  ;;  %972 = vadd.xlane.f32.xlu1 %v2126_v11 }
 0x27a   : > { %v924_v48 = vmul.f32 1.442695, %v873_v46  ;;  %966 = vadd.xlane.f32.xlu0 %v2129_v8  ;;  %v823_v10 = vpop.xlane.xlu0 %822  ;;  %v2134_v14 = vpop.eup %1674 }
 0x27b   : > { %1684 = vpow2.f32 %v922_v12  ;;  %v870_v13 = vsub.f32 %v2027_v19, %v823_v10  ;;  %v825_v50 = vpop.xlane.xlu1 %824 }
 0x27c   : > { %v871_v15 = vsub.f32 %v2030_v20, %v825_v50  ;;  %1686 = vpow2.f32 %v924_v48 }
 0x27d   : > { %v2137_v51 = vpop.eup %1676  ;;  %v918_v17 = vmul.f32 1.442695, %v870_v13  ;;  %968 = vadd.xlane.f32.xlu1 %v2134_v14 }
 0x27e   : > { %v920_v18 = vmul.f32 1.442695, %v871_v15  ;;  %978 = vadd.xlane.f32.xlu0 %v2137_v51  ;;  %v835_v53 = vpop.xlane.xlu0 %834  ;;  %v2142_v19 = vpop.eup %1678 }
 0x27f   : > { %1688 = vpow2.f32 %v918_v17  ;;  %v876_v21 = vsub.f32 %v2034_v22, %v835_v53  ;;  %v837_v56 = vpop.xlane.xlu1 %836 }
 0x280   : > { %v877_v24 = vsub.f32 %v2038_v25, %v837_v56  ;;  %1690 = vpow2.f32 %v920_v18 }
 0x281   : > { %v2145_v59 = vpop.eup %1680  ;;  %v930_v20 = vmul.f32 1.442695, %v876_v21  ;;  %980 = vadd.xlane.f32.xlu1 %v2142_v19 }
 0x282   : > { %v932_v29 = vmul.f32 1.442695, %v877_v24  ;;  %974 = vadd.xlane.f32.xlu0 %v2145_v59  ;;  %v831_v60 = vpop.xlane.xlu0 %830  ;;  %v2150_v22 = vpop.eup %1682 }
 0x283   : > { %1692 = vpow2.f32 %v930_v20  ;;  %v874_v31 = vsub.f32 %v2043_v27, %v831_v60  ;;  %v833_v32 = vpop.xlane.xlu1 %832 }
 0x284   : > { %v875_v34 = vsub.f32 %v2046_v28, %v833_v32  ;;  %1694 = vpow2.f32 %v932_v29 }
 0x285   : > { %v2153_v62 = vpop.eup %1684  ;;  %v926_v25 = vmul.f32 1.442695, %v874_v31  ;;  %976 = vadd.xlane.f32.xlu1 %v2150_v22 }
 0x286   : > { %v928_v40 = vmul.f32 1.442695, %v875_v34  ;;  %986 = vadd.xlane.f32.xlu0 %v2153_v62  ;;  %v843_v1 = vpop.xlane.xlu0 %842  ;;  %v2158_v27 = vpop.eup %1686 }
 0x287   : > { %1696 = vpow2.f32 %v926_v25  ;;  %v880_v41 = vsub.f32 %v2050_v30, %v843_v1  ;;  %v845_v47 = vpop.xlane.xlu1 %844 }
 0x288   : > { %v881_v58 = vsub.f32 %v2054_v33, %v845_v47  ;;  %1698 = vpow2.f32 %v928_v40 }
 0x289   : > { %v2161_v49 = vpop.eup %1688  ;;  %v938_v28 = vmul.f32 1.442695, %v880_v41  ;;  %988 = vadd.xlane.f32.xlu1 %v2158_v27 }
 0x28a   : > { %v940_v4 = vmul.f32 1.442695, %v881_v58  ;;  %982 = vadd.xlane.f32.xlu0 %v2161_v49  ;;  %v839_v54 = vpop.xlane.xlu0 %838  ;;  %v2166_v30 = vpop.eup %1690 }
 0x28b   : > { %1700 = vpow2.f32 %v938_v28  ;;  %v878_v55 = vsub.f32 %v2059_v35, %v839_v54  ;;  %v841_v57 = vpop.xlane.xlu1 %840 }
 0x28c   : > { %v879_v61 = vsub.f32 %v2062_v36, %v841_v57  ;;  %1702 = vpow2.f32 %v940_v4 }
 0x28d   : > { %v2169_v63 = vpop.eup %1692  ;;  %v934_v33 = vmul.f32 1.442695, %v878_v55  ;;  %984 = vadd.xlane.f32.xlu1 %v2166_v30 }
 0x28e   : > { %v936_v9 = vmul.f32 1.442695, %v879_v61  ;;  %994 = vadd.xlane.f32.xlu0 %v2169_v63  ;;  %v847_v0 = vpop.xlane.xlu0 %846  ;;  %v2174_v5 = vpop.eup %1694 }
 0x28f   : > { %1704 = vpow2.f32 %v934_v33  ;;  %v882_v2 = vsub.f32 %v2067_v39, %v847_v0 }
 0x290   : > { %v849_v35 = vpop.xlane.xlu1 %848  ;;  %1706 = vpow2.f32 %v936_v9 }
 0x291   : > { %v2176_v7 = vpop.eup %1696  ;;  %v942_v46 = vmul.f32 1.442695, %v882_v2  ;;  %v883_v36 = vsub.f32 %v2070_v42, %v849_v35  ;;  %996 = vadd.xlane.f32.xlu1 %v2174_v5 }
 0x292   : > { %990 = vadd.xlane.f32.xlu0 %v2176_v7  ;;  %v851_v12 = vpop.xlane.xlu0 %850  ;;  %v2182_v13 = vpop.eup %1698 }
 0x293   : > { %1708 = vpow2.f32 %v942_v46  ;;  %v944_v48 = vmul.f32 1.442695, %v883_v36  ;;  %v884_v10 = vsub.f32 %v2074_v43, %v851_v12 }
 0x294   : > { %v853_v39 = vpop.xlane.xlu1 %852 }
 0x295   : > { %v2184_v50 = vpop.eup %1700  ;;  %1710 = vpow2.f32 %v944_v48  ;;  %v946_v15 = vmul.f32 1.442695, %v884_v10  ;;  %v885_v17 = vsub.f32 %v2078_v45, %v853_v39  ;;  %992 = vadd.xlane.f32.xlu1 %v2182_v13 }
 0x296   : > { %1002 = vadd.xlane.f32.xlu0 %v2184_v50  ;;  %v2189_v18 = vpop.eup %1702 }
 0x297   : > { %1712 = vpow2.f32 %v946_v15  ;;  %v948_v42 = vmul.f32 1.442695, %v885_v17 }
 0x299   : > { %v2191_v53 = vpop.eup %1704  ;;  %1714 = vpow2.f32 %v948_v42  ;;  %1004 = vadd.xlane.f32.xlu1 %v2189_v18 }
 0x29a   : > { %998 = vadd.xlane.f32.xlu0 %v2191_v53  ;;  %v2195_v43 = vpop.eup %1706 }
 0x29d   : > { %v2197_v21 = vpop.eup %1708  ;;  %1000 = vadd.xlane.f32.xlu1 %v2195_v43 }
 0x29e   : > { %1006 = vadd.xlane.f32.xlu0 %v2197_v21 }
 0x29f   : > { %v2201_v45 = vpop.eup %1710 }
 0x2a1   : > { %v2203_v56 = vpop.eup %1712  ;;  %1008 = vadd.xlane.f32.xlu1 %v2201_v45 }
 0x2a2   : > { %1010 = vadd.xlane.f32.xlu0 %v2203_v56 }
 0x2a3   : > { %v2207_v24 = vpop.eup %1714 }
 0x2a5   : > { %1012 = vadd.xlane.f32.xlu1 %v2207_v24 }
 0x2f2   : > { %v955_v20 = vpop.xlane.xlu0 %954 }
 0x2f3   : > { %1716 = vrcp.f32 %v955_v20 }
 0x2f6   : > { %v957_v29 = vpop.xlane.xlu1 %956  ;;  %v951_v60 = vpop.xlane.xlu0 %950 }
 0x2f7   : > { %1718 = vrcp.f32 %v957_v29 }
 0x2f8   : > { %1720 = vrcp.f32 %v951_v60 }
 0x2fa   : > { %v953_v31 = vpop.xlane.xlu1 %952 }
 0x2fb   : > { %1722 = vrcp.f32 %v953_v31  ;;  %v963_v32 = vpop.xlane.xlu0 %962 }
 0x2fc   : > { %1724 = vrcp.f32 %v963_v32 }
 0x2fd   : > { %v1717_v25 = vpop.eup %1716 }
 0x2fe   : > { %v965_v34 = vpop.xlane.xlu1 %964  ;;  %v1048_v41 = vmul.f32 %v1717_v25, %v2089_v16 }
 0x2ff   : > { %1726 = vrcp.f32 %v965_v34  ;;  %v959_v40 = vpop.xlane.xlu0 %958 }
 0x300   : > { %1728 = vrcp.f32 %v959_v40 }
 0x301   : > { %v1719_v1 = vpop.eup %1718 }
 0x302   : > { %v1049_v47 = vmul.f32 %v1719_v1, %v2096_v26  ;;  %v961_v58 = vpop.xlane.xlu1 %960  ;;  %v1721_v28 = vpop.eup %1720 }
 0x303   : > { %1730 = vrcp.f32 %v961_v58  ;;  %v971_v4 = vpop.xlane.xlu0 %970  ;;  %v1046_v57 = vmul.f32 %v1721_v28, %v2093_v23 }
 0x304   : > { %v1405_v54 = vpack.c.bf16 %v1049_v47, %v1048_v41  ;;  %1732 = vrcp.f32 %v971_v4 }
 0x305   : > { %v1723_v55 = vpop.eup %1722 }
 0x306   : > { %1477 = vst [vmem:[%s2216_s29 + $0x8] sm:$0xff] %v1405_v54   ;;  %v1047_v16 = vmul.f32 %v1723_v55, %v2102_v37  ;;  %v973_v26 = vpop.xlane.xlu1 %972  ;;  %v1725_v61 = vpop.eup %1724 }
 0x307   : > { %1734 = vrcp.f32 %v973_v26  ;;  %v967_v33 = vpop.xlane.xlu0 %966  ;;  %v1052_v2 = vmul.f32 %v1725_v61, %v2105_v38 }
 0x308   : > { %v1400_v9 = vpack.c.bf16 %v1047_v16, %v1046_v57  ;;  %1736 = vrcp.f32 %v967_v33 }
 0x309   : > { %v1727_v0 = vpop.eup %1726 }
 0x30a   : > { %1401 = vst [vmem:[%s2216_s29] sm:$0xff] %v1400_v9   ;;  %v1053_v35 = vmul.f32 %v1727_v0, %v2110_v3  ;;  %v969_v46 = vpop.xlane.xlu1 %968  ;;  %v1729_v36 = vpop.eup %1728 }
 0x30b   : > { %1738 = vrcp.f32 %v969_v46  ;;  %v979_v23 = vpop.xlane.xlu0 %978  ;;  %v1050_v48 = vmul.f32 %v1729_v36, %v2113_v52 }
 0x30c   : > { %v1415_v12 = vpack.c.bf16 %v1053_v35, %v1052_v2  ;;  %1740 = vrcp.f32 %v979_v23 }
 0x30d   : > { %v1731_v37 = vpop.eup %1730 }
 0x30e   : > { %1479 = vst [vmem:[%s2216_s29 + $0x18] sm:$0xff] %v1415_v12   ;;  %v1051_v10 = vmul.f32 %v1731_v37, %v2118_v6  ;;  %v981_v39 = vpop.xlane.xlu1 %980  ;;  %v1733_v15 = vpop.eup %1732 }
 0x30f   : > { %1742 = vrcp.f32 %v981_v39  ;;  %v975_v38 = vpop.xlane.xlu0 %974  ;;  %v1056_v42 = vmul.f32 %v1733_v15, %v2121_v44 }
 0x310   : > { %v1410_v17 = vpack.c.bf16 %v1051_v10, %v1050_v48  ;;  %1744 = vrcp.f32 %v975_v38 }
 0x311   : > { %v1735_v3 = vpop.eup %1734 }
 0x312   : > { %1478 = vst [vmem:[%s2216_s29 + $0x10] sm:$0xff] %v1410_v17   ;;  %v1057_v20 = vmul.f32 %v1735_v3, %v2126_v11  ;;  %v977_v29 = vpop.xlane.xlu1 %976  ;;  %v1737_v60 = vpop.eup %1736 }
 0x313   : > { %1746 = vrcp.f32 %v977_v29  ;;  %v987_v52 = vpop.xlane.xlu0 %986  ;;  %v1054_v32 = vmul.f32 %v1737_v60, %v2129_v8 }
 0x314   : > { %v1425_v31 = vpack.c.bf16 %v1057_v20, %v1056_v42  ;;  %1748 = vrcp.f32 %v987_v52 }
 0x315   : > { %v1739_v6 = vpop.eup %1738 }
 0x316   : > { %1481 = vst [vmem:[%s2216_s29 + $0x28] sm:$0xff] %v1425_v31   ;;  %v1055_v34 = vmul.f32 %v1739_v6, %v2134_v14  ;;  %v989_v25 = vpop.xlane.xlu1 %988  ;;  %v1741_v40 = vpop.eup %1740 }
 0x317   : > { %1750 = vrcp.f32 %v989_v25  ;;  %v983_v44 = vpop.xlane.xlu0 %982  ;;  %v1060_v41 = vmul.f32 %v1741_v40, %v2137_v51 }
 0x318   : > { %v1420_v1 = vpack.c.bf16 %v1055_v34, %v1054_v32  ;;  %1752 = vrcp.f32 %v983_v44 }
 0x319   : > { %v1743_v11 = vpop.eup %1742 }
 0x31a   : > { %1480 = vst [vmem:[%s2216_s29 + $0x20] sm:$0xff] %v1420_v1   ;;  %v1061_v47 = vmul.f32 %v1743_v11, %v2142_v19  ;;  %v985_v58 = vpop.xlane.xlu1 %984  ;;  %v1745_v28 = vpop.eup %1744 }
 0x31b   : > { %1754 = vrcp.f32 %v985_v58  ;;  %v995_v8 = vpop.xlane.xlu0 %994  ;;  %v1058_v54 = vmul.f32 %v1745_v28, %v2145_v59 }
 0x31c   : > { %v1435_v4 = vpack.c.bf16 %v1061_v47, %v1060_v41  ;;  %1756 = vrcp.f32 %v995_v8 }
 0x31d   : > { %v1747_v14 = vpop.eup %1746 }
 0x31e   : > { %1483 = vst [vmem:[%s2216_s29 + $0x38] sm:$0xff] %v1435_v4   ;;  %v1059_v55 = vmul.f32 %v1747_v14, %v2150_v22  ;;  %v997_v57 = vpop.xlane.xlu1 %996  ;;  %v1749_v16 = vpop.eup %1748 }
 0x31f   : > { %1758 = vrcp.f32 %v997_v57  ;;  %v991_v51 = vpop.xlane.xlu0 %990  ;;  %v1064_v61 = vmul.f32 %v1749_v16, %v2153_v62 }
 0x320   : > { %v1430_v26 = vpack.c.bf16 %v1059_v55, %v1058_v54  ;;  %1760 = vrcp.f32 %v991_v51 }
 0x321   : > { %v1751_v19 = vpop.eup %1750 }
 0x322   : > { %1482 = vst [vmem:[%s2216_s29 + $0x30] sm:$0xff] %v1430_v26   ;;  %v1065_v33 = vmul.f32 %v1751_v19, %v2158_v27  ;;  %v993_v9 = vpop.xlane.xlu1 %992  ;;  %v1753_v0 = vpop.eup %1752 }
 0x323   : > { %1762 = vrcp.f32 %v993_v9  ;;  %v1003_v59 = vpop.xlane.xlu0 %1002  ;;  %v1062_v35 = vmul.f32 %v1753_v0, %v2161_v49 }
 0x324   : > { %v1445_v2 = vpack.c.bf16 %v1065_v33, %v1064_v61  ;;  %1764 = vrcp.f32 %v1003_v59 }
 0x325   : > { %v1755_v22 = vpop.eup %1754 }
 0x326   : > { %1485 = vst [vmem:[%s2216_s29 + $0x48] sm:$0xff] %v1445_v2   ;;  %v1063_v46 = vmul.f32 %v1755_v22, %v2166_v30  ;;  %v1005_v36 = vpop.xlane.xlu1 %1004  ;;  %v1757_v23 = vpop.eup %1756 }
 0x327   : > { %1766 = vrcp.f32 %v1005_v36  ;;  %v999_v62 = vpop.xlane.xlu0 %998  ;;  %v1068_v37 = vmul.f32 %v1757_v23, %v2169_v63 }
 0x328   : > { %v1440_v12 = vpack.c.bf16 %v1063_v46, %v1062_v35  ;;  %1768 = vrcp.f32 %v999_v62 }
 0x329   : > { %v1759_v27 = vpop.eup %1758 }
 0x32a   : > { %1484 = vst [vmem:[%s2216_s29 + $0x40] sm:$0xff] %v1440_v12   ;;  %v1069_v48 = vmul.f32 %v1759_v27, %v2174_v5  ;;  %v1001_v10 = vpop.xlane.xlu1 %1000  ;;  %v1761_v39 = vpop.eup %1760 }
 0x32b   : > { %1770 = vrcp.f32 %v1001_v10  ;;  %v1007_v49 = vpop.xlane.xlu0 %1006  ;;  %v1066_v38 = vmul.f32 %v1761_v39, %v2176_v7 }
 0x32c   : > { %v1455_v15 = vpack.c.bf16 %v1069_v48, %v1068_v37  ;;  %1772 = vrcp.f32 %v1007_v49 }
 0x32d   : > { %v1763_v30 = vpop.eup %1762 }
 0x32e   : > { %1487 = vst [vmem:[%s2216_s29 + $0x58] sm:$0xff] %v1455_v15   ;;  %v1067_v17 = vmul.f32 %v1763_v30, %v2182_v13  ;;  %v1009_v3 = vpop.xlane.xlu1 %1008  ;;  %v1765_v42 = vpop.eup %1764 }
 0x32f   : > { %1774 = vrcp.f32 %v1009_v3  ;;  %v1011_v63 = vpop.xlane.xlu0 %1010  ;;  %v1072_v29 = vmul.f32 %v1765_v42, %v2184_v50 }
 0x330   : > { %v1450_v20 = vpack.c.bf16 %v1067_v17, %v1066_v38  ;;  %1776 = vrcp.f32 %v1011_v63 }
 0x331   : > { %v1767_v5 = vpop.eup %1766 }
 0x332   : > { %1486 = vst [vmem:[%s2216_s29 + $0x50] sm:$0xff] %v1450_v20   ;;  %v1073_v60 = vmul.f32 %v1767_v5, %v2189_v18  ;;  %v1013_v52 = vpop.xlane.xlu1 %1012  ;;  %v1769_v31 = vpop.eup %1768 }
 0x333   : > { %1778 = vrcp.f32 %v1013_v52  ;;  %v1070_v6 = vmul.f32 %v1769_v31, %v2191_v53 }
 0x334   : > { %v1465_v7 = vpack.c.bf16 %v1073_v60, %v1072_v29 }
 0x335   : > { %v1771_v13 = vpop.eup %1770 }
 0x336   : > { %1489 = vst [vmem:[%s2216_s29 + $0x68] sm:$0xff] %v1465_v7   ;;  %v1071_v32 = vmul.f32 %v1771_v13, %v2195_v43  ;;  %v1773_v34 = vpop.eup %1772 }
 0x337   : > { %v1074_v50 = vmul.f32 %v1773_v34, %v2197_v21 }
 0x338   : > { %v1460_v25 = vpack.c.bf16 %v1071_v32, %v1070_v6 }
 0x339   : > { %v1775_v40 = vpop.eup %1774 }
 0x33a   : > { %1488 = vst [vmem:[%s2216_s29 + $0x60] sm:$0xff] %v1460_v25   ;;  %v1075_v18 = vmul.f32 %v1775_v40, %v2201_v45  ;;  %v1777_v44 = vpop.eup %1776 }
 0x33b   : > { %v1076_v41 = vmul.f32 %v1777_v44, %v2203_v56 }
 0x33c   : > { %v1470_v1 = vpack.c.bf16 %v1075_v18, %v1074_v50 }
 0x33d   : > { %v1779_v11 = vpop.eup %1778 }
 0x33e   : > { %1490 = vst [vmem:[%s2216_s29 + $0x70] sm:$0xff] %v1470_v1   ;;  %v1077_v47 = vmul.f32 %v1779_v11, %v2207_v24 }
 0x340   : > { %v1475_v58 = vpack.c.bf16 %v1077_v47, %v1076_v41 }
 0x342   : > { %1491 = vst [vmem:[%s2216_s29 + $0x78] sm:$0xff] %v1475_v58  }
 0x343 PF: > { %s15_s18 = sadd.s32 1, %s1786_s18  }
 0x344   : > { %p12_p4 = scmp.ge.s32.totalorder %s15_s18, 4  }
 0x346   :  { %14 = sbr.rel (!%p12_p4) target bundleno = 1 (0x1), region = 70 }

</bundles_post_ra>
